<compile_context>
chip_gen: v5e
topology: v5e:2x2
jax: 0.10.0
libtpu: 0.0.40
codegen_flags: <defaults>
</compile_context>

<pallas_src>
import functools
import math

import jax
import jax.numpy as jnp
from jax.experimental import pallas as pl
from jax.experimental.pallas import tpu as pltpu


def _choose_query_tile(seq_len, target):
    """Largest query tile <= target that divides seq_len and is 8-aligned."""
    if seq_len <= target:
        return seq_len
    t = (min(target, seq_len) // 8) * 8
    while t >= 8:
        if seq_len % t == 0:
            return t
        t -= 8
    return seq_len  # no aligned divisor -> process the whole sequence per step


def _vmem_limit_bytes(S, H, tq, itemsize, has_mask, mask_rows):
    """Scoped-VMEM limit sized to the kernel's real working set (+margin)."""
    f32 = 4
    weights = (4 * H * H + 6 * H) * itemsize          # single-buffered constants
    x_in = 2 * S * H * itemsize                       # double-buffered input (per batch)
    out = 2 * tq * H * itemsize                       # double-buffered output tile
    mask = (2 * mask_rows * S * f32) if has_mask else 0
    kv_scratch = 2 * S * H * itemsize                 # persistent K / V scratch
    # transient f32 values: scores+probs, q / acc / LayerNorm temps, K/V proj temps
    live = (2 * tq * S + 6 * tq * H + 2 * S * H) * f32
    need = weights + x_in + out + mask + kv_scratch + live
    limit = max(int(1.5 * need) + (8 << 20), 32 << 20)
    try:
        cap = int(0.9 * pltpu.get_tpu_info().vmem_capacity_bytes)
    except Exception:
        cap = 64 << 20                                # v7x physical VMEM per TC
    return min(limit, cap)


def _mha_kernel(*refs, n_heads, eps, scale, has_mask):
    if has_mask:
        (x_ref, m_ref, wq_ref, bq_ref, wk_ref, bk_ref, wv_ref, bv_ref,
         wd_ref, bd_ref, g_ref, bln_ref, o_ref, k_s, v_s) = refs
    else:
        (x_ref, wq_ref, bq_ref, wk_ref, bk_ref, wv_ref, bv_ref,
         wd_ref, bd_ref, g_ref, bln_ref, o_ref, k_s, v_s) = refs
        m_ref = None

    dt = x_ref.dtype
    S, H = x_ref.shape
    tq = o_ref.shape[0]
    d = H // n_heads
    t = pl.program_id(1)

    # --- K / V projections for the full sequence, once per batch element ----
    @pl.when(t == 0)
    def _():
        x_all = x_ref[...]
        k_s[...] = (jnp.dot(x_all, wk_ref[...], preferred_element_type=jnp.float32)
                    + bk_ref[...].astype(jnp.float32)).astype(dt)
        v_s[...] = (jnp.dot(x_all, wv_ref[...], preferred_element_type=jnp.float32)
                    + bv_ref[...].astype(jnp.float32)).astype(dt)

    # --- Q projection for this query tile; 1/sqrt(d) folded in once here ----
    q_start = pl.multiple_of(t * tq, tq)
    x_t = x_ref[pl.ds(q_start, tq), :]                                # (tq, H)
    q = ((jnp.dot(x_t, wq_ref[...], preferred_element_type=jnp.float32)
          + bq_ref[...].astype(jnp.float32)) * scale).astype(dt)

    # Additive mask block: (1, S) key-only mask or (tq, S) full-mask rows.
    mask = m_ref[...].astype(jnp.float32) if has_mask else None

    # --- per-head attention, output projection fused into the head loop -----
    # TODO(synk): for n_heads >= 8 switch this static unroll to a
    # lax.fori_loop(..., unroll=2) over a q/ctx VMEM scratch (pl.ds slices)
    # to bound vreg live ranges; also consider 2-head-batched einsums when
    # d < 128 to fill the 256-wide MXU on v6e/v7x.
    acc = None
    for h in range(n_heads):
        lo, hi = h * d, (h + 1) * d
        qh = q[:, lo:hi]                                              # (tq, d)
        kh = k_s[:, lo:hi]                                            # (S, d)
        vh = v_s[:, lo:hi]                                            # (S, d)

        s = jax.lax.dot_general(qh, kh, (((1,), (1,)), ((), ())),
                                preferred_element_type=jnp.float32)   # (tq, S)
        if mask is not None:
            s = s + mask

        # Max-stabilized softmax with deferred normalization: normalize the
        # (tq, d) context with one reciprocal per row instead of dividing the
        # (tq, S) probability matrix.
        s = s - jnp.max(s, axis=-1, keepdims=True)
        p = jnp.exp(s)
        denom = jnp.sum(p, axis=-1, keepdims=True)                    # (tq, 1)

        # TODO(synk): attn_dropout is identity here (eval mode); training-mode
        # dropout would use pltpu.prng_seed + pltpu.stateful_bernoulli on `p`.
        ctx_h = jnp.dot(p.astype(dt), vh, preferred_element_type=jnp.float32)
        # approx=True would keep the reciprocal entirely on the EUP; exact is
        # used so the f32 demo stays within 1e-4 of the reference.
        ctx_h = ctx_h * pl.reciprocal(denom, approx=False)

        part = jnp.dot(ctx_h.astype(dt), wd_ref[lo:hi, :],
                       preferred_element_type=jnp.float32)            # (tq, H)
        acc = part if acc is None else acc + part

    # TODO(synk): out_dropout is identity here (eval mode).
    h_out = acc + bd_ref[...].astype(jnp.float32)

    # --- residual + LayerNorm (f32 statistics) on the query-tile rows -------
    y = h_out + x_t.astype(jnp.float32)
    mean = jnp.mean(y, axis=-1, keepdims=True)
    var = jnp.mean(jnp.square(y - mean), axis=-1, keepdims=True)
    y = (y - mean) * jax.lax.rsqrt(var + eps)
    y = y * g_ref[...].astype(jnp.float32) + bln_ref[...].astype(jnp.float32)
    o_ref[...] = y.astype(o_ref.dtype)


def multi_head_attention(x, wq, bq, wk, bk, wv, bv, wd, bd, gamma, beta,
                         *, n_heads, eps, attention_mask=None,
                         q_tile_target=256):
    """x: [B, S, H]; weights [in, out]; mask: (B,S), (B,1,S) or (B,S,S)."""
    B, S, H = x.shape
    assert H % n_heads == 0
    d = H // n_heads
    scale = 1.0 / math.sqrt(d)
    has_mask = attention_mask is not None

    tq = _choose_query_tile(S, q_tile_target)
    nq = S // tq

    row = lambda a: a.reshape(1, -1)
    # Constant-index operands: single-buffered (second pipeline buffer is waste).
    const_spec = lambda shp: pl.BlockSpec(shp, lambda b, t: (0, 0),
                                          pipeline_mode=pl.Buffered(1))

    args = [x]
    in_specs = [pl.BlockSpec((None, S, H), lambda b, t: (b, 0, 0))]

    mask_rows = 0
    mask_bytes = 0
    if has_mask:
        am = attention_mask
        if am.ndim == 2:                      # (B, S) key-validity mask
            am = am[:, None, :]
        if am.shape[1] == 1:                  # (B, 1, S): broadcast in-kernel
            mask_rows = 1
            in_specs.append(pl.BlockSpec((None, 1, S), lambda b, t: (b, 0, 0)))
        else:                                 # (B, S, S): stream this tile's rows
            mask_rows = tq
            in_specs.append(pl.BlockSpec((None, tq, S), lambda b, t: (b, t, 0)))
        args.append(am)
        mask_bytes = B * am.shape[1] * S * jnp.dtype(am.dtype).itemsize

    args += [wq, row(bq), wk, row(bk), wv, row(bv), wd, row(bd),
             row(gamma), row(beta)]
    in_specs += [const_spec((H, H)), const_spec((1, H)),   # Wq, bq
                 const_spec((H, H)), const_spec((1, H)),   # Wk, bk
                 const_spec((H, H)), const_spec((1, H)),   # Wv, bv
                 const_spec((H, H)), const_spec((1, H)),   # Wd, bd
                 const_spec((1, H)), const_spec((1, H))]   # gamma, beta

    itemsize = jnp.dtype(x.dtype).itemsize
    vmem_limit = _vmem_limit_bytes(S, H, tq, itemsize, has_mask, mask_rows)

    # Advisory cost estimate so XLA schedules neighbors around the kernel.
    bytes_accessed = (2 * B * S * H + 4 * H * H + 6 * H) * itemsize + mask_bytes
    cost = pl.CostEstimate(
        flops=8 * B * S * H * H + 4 * B * S * S * H,
        transcendentals=B * n_heads * S * S,
        bytes_accessed=bytes_accessed)

    kernel = functools.partial(_mha_kernel, n_heads=n_heads, eps=eps,
                               scale=scale, has_mask=has_mask)

    return pl.pallas_call(
        kernel,
        out_shape=jax.ShapeDtypeStruct((B, S, H), x.dtype),
        grid_spec=pltpu.PrefetchScalarGridSpec(
            num_scalar_prefetch=0,
            grid=(B, nq),
            in_specs=in_specs,
            out_specs=pl.BlockSpec((None, tq, H), lambda b, t: (b, t, 0)),
            scratch_shapes=[pltpu.VMEM((S, H), x.dtype),   # K (all heads, full seq)
                            pltpu.VMEM((S, H), x.dtype)],  # V
        ),
        compiler_params=pltpu.CompilerParams(
            # Query-tile axis is "arbitrary": it carries the resident-K/V state.
            dimension_semantics=("parallel", "arbitrary"),
            vmem_limit_bytes=vmem_limit),
        cost_estimate=cost,
    )(*args)


def multi_head_attention_ref(x, wq, bq, wk, bk, wv, bv, wd, bd, gamma, beta,
                             *, n_heads, eps, attention_mask=None):
    # Pure-JAX reference mirroring the PyTorch module (eval mode).
    B, S, H = x.shape
    d = H // n_heads
    q = (x @ wq + bq).reshape(B, S, n_heads, d).transpose(0, 2, 1, 3)
    k = (x @ wk + bk).reshape(B, S, n_heads, d).transpose(0, 2, 1, 3)
    v = (x @ wv + bv).reshape(B, S, n_heads, d).transpose(0, 2, 1, 3)
    s = jnp.einsum('bhqd,bhkd->bhqk', q, k) / math.sqrt(d)
    if attention_mask is not None:
        am = attention_mask
        if am.ndim == 2:
            am = am[:, None, None, :]
        elif am.ndim == 3:
            am = am[:, None, :, :]
        s = s + am
    p = jax.nn.softmax(s, axis=-1)
    ctx = jnp.einsum('bhqk,bhkd->bhqd', p, v)
    ctx = ctx.transpose(0, 2, 1, 3).reshape(B, S, H)
    h = ctx @ wd + bd
    y = h + x
    mean = jnp.mean(y, axis=-1, keepdims=True)
    var = jnp.mean(jnp.square(y - mean), axis=-1, keepdims=True)
    return (y - mean) * jax.lax.rsqrt(var + eps) * gamma + beta


if __name__ == "__main__":
    # Small, module-consistent shapes.
    B, S = 2, 8
    n_heads = 2
    hidden_size = 32
    layer_norm_eps = 1e-12
    # hidden_dropout_prob = 0.5, attn_dropout_prob = 0.5  (inference -> identity)

    key = jax.random.PRNGKey(0)
    kx, k1, k2, k3, k4, k5, k6, k7, k8 = jax.random.split(key, 9)

    x = jax.random.normal(kx, (B, S, hidden_size), dtype=jnp.float32)

    lim = 1.0 / math.sqrt(hidden_size)
    uni = lambda k, shp: jax.random.uniform(k, shp, jnp.float32, -lim, lim)
    wq, bq = uni(k1, (hidden_size, hidden_size)), uni(k2, (hidden_size,))
    wk, bk = uni(k3, (hidden_size, hidden_size)), uni(k4, (hidden_size,))
    wv, bv = uni(k5, (hidden_size, hidden_size)), uni(k6, (hidden_size,))
    wd, bd = uni(k7, (hidden_size, hidden_size)), uni(k8, (hidden_size,))
    gamma = jnp.ones((hidden_size,), jnp.float32)
    beta = jnp.zeros((hidden_size,), jnp.float32)
    weights = (wq, bq, wk, bk, wv, bv, wd, bd, gamma, beta)
    params = dict(n_heads=n_heads, eps=layer_norm_eps)

    # recbole-style key-validity mask: 0 for valid keys, -10000 for padding.
    lengths = jnp.array([S, 5], dtype=jnp.int32)
    key_valid = jnp.arange(S)[None, :] < lengths[:, None]                # (B, S)
    key_mask = jnp.where(key_valid, 0.0, -10000.0).astype(jnp.float32)   # (B, S)
    full_mask = jnp.broadcast_to(key_mask[:, None, :], (B, S, S))        # (B, S, S)

    # 1) no attention mask (module default attention_mask=None).
    out0 = jax.block_until_ready(multi_head_attention(x, *weights, **params))
    ref0 = multi_head_attention_ref(x, *weights, **params)
    assert out0.shape == (B, S, hidden_size)
    assert jnp.allclose(out0, ref0, atol=1e-4, rtol=1e-4)

    # 2) key-validity mask via the memory-lean (B, S) path.
    out1 = jax.block_until_ready(
        multi_head_attention(x, *weights, attention_mask=key_mask, **params))
    ref1 = multi_head_attention_ref(x, *weights, attention_mask=key_mask,
                                    **params)
    assert jnp.allclose(out1, ref1, atol=1e-4, rtol=1e-4)

    # 3) general additive (B, S, S) mask, as the PyTorch module allows.
    out2 = jax.block_until_ready(
        multi_head_attention(x, *weights, attention_mask=full_mask, **params))
    assert jnp.allclose(out2, ref1, atol=1e-4, rtol=1e-4)

    # 4) bf16 activations/weights (recommended operating point on v6e/v7x);
    #    f32 MXU accumulation + f32 softmax/LayerNorm epilogue in the kernel.
    bf = lambda a: a.astype(jnp.bfloat16)
    out3 = jax.block_until_ready(
        multi_head_attention(bf(x), *[bf(w) for w in weights],
                             attention_mask=key_mask, **params))
    assert out3.dtype == jnp.bfloat16
    assert jnp.allclose(out3.astype(jnp.float32), ref1, atol=5e-2, rtol=5e-2)

    print("KERNEL_OK")
</pallas_src>

<mosaic_0001>
module attributes {stable_mosaic.version = 11 : i64} {
  func.func @_mha_kernel(%arg0: i32, %arg1: i32, %arg2: memref<1x8x32xf32, #tpu.memory_space<vmem>>, %arg3: memref<32x32xf32, #tpu.memory_space<vmem>>, %arg4: memref<1x32xf32, #tpu.memory_space<vmem>>, %arg5: memref<32x32xf32, #tpu.memory_space<vmem>>, %arg6: memref<1x32xf32, #tpu.memory_space<vmem>>, %arg7: memref<32x32xf32, #tpu.memory_space<vmem>>, %arg8: memref<1x32xf32, #tpu.memory_space<vmem>>, %arg9: memref<32x32xf32, #tpu.memory_space<vmem>>, %arg10: memref<1x32xf32, #tpu.memory_space<vmem>>, %arg11: memref<1x32xf32, #tpu.memory_space<vmem>>, %arg12: memref<1x32xf32, #tpu.memory_space<vmem>>, %arg13: memref<1x8x32xf32, #tpu.memory_space<vmem>>, %arg14: memref<8x32xf32, #tpu.memory_space<vmem>>, %arg15: memref<8x32xf32, #tpu.memory_space<vmem>>) attributes {dimension_semantics = [#tpu.dimension_semantics<parallel>, #tpu.dimension_semantics<arbitrary>], iteration_bounds = array<i64: 2, 1>, scalar_prefetch = 0 : i64, scratch_operands = 2 : i64, tpu.core_type = #tpu.core_type<tc>, window_params = [{transform_indices = @transform_0, window_bounds = array<i64: 1, 8, 32>}, {pipeline_mode = #tpu.pipeline_mode<synchronous>, transform_indices = @transform_1, window_bounds = array<i64: 32, 32>}, {pipeline_mode = #tpu.pipeline_mode<synchronous>, transform_indices = @transform_2, window_bounds = array<i64: 1, 32>}, {pipeline_mode = #tpu.pipeline_mode<synchronous>, transform_indices = @transform_3, window_bounds = array<i64: 32, 32>}, {pipeline_mode = #tpu.pipeline_mode<synchronous>, transform_indices = @transform_4, window_bounds = array<i64: 1, 32>}, {pipeline_mode = #tpu.pipeline_mode<synchronous>, transform_indices = @transform_5, window_bounds = array<i64: 32, 32>}, {pipeline_mode = #tpu.pipeline_mode<synchronous>, transform_indices = @transform_6, window_bounds = array<i64: 1, 32>}, {pipeline_mode = #tpu.pipeline_mode<synchronous>, transform_indices = @transform_7, window_bounds = array<i64: 32, 32>}, {pipeline_mode = #tpu.pipeline_mode<synchronous>, transform_indices = @transform_8, window_bounds = array<i64: 1, 32>}, {pipeline_mode = #tpu.pipeline_mode<synchronous>, transform_indices = @transform_9, window_bounds = array<i64: 1, 32>}, {pipeline_mode = #tpu.pipeline_mode<synchronous>, transform_indices = @transform_10, window_bounds = array<i64: 1, 32>}, {transform_indices = @transform_11, window_bounds = array<i64: 1, 8, 32>}]} {
    %c0_i32 = arith.constant 0 : i32
    %0 = arith.cmpi eq, %arg1, %c0_i32 : i32
    %1 = arith.extui %0 : i1 to i32
    %c0_i32_0 = arith.constant 0 : i32
    %2 = arith.cmpi ne, %1, %c0_i32_0 : i32
    scf.if %2 {
      %c0_42 = arith.constant 0 : index
      %c0_43 = arith.constant 0 : index
      %c0_44 = arith.constant 0 : index
      %81 = vector.load %arg2[%c0_42, %c0_43, %c0_44] : memref<1x8x32xf32, #tpu.memory_space<vmem>>, vector<1x8x32xf32>
      %82 = vector.shape_cast %81 : vector<1x8x32xf32> to vector<8x32xf32>
      %c0_45 = arith.constant 0 : index
      %c0_46 = arith.constant 0 : index
      %83 = vector.load %arg5[%c0_45, %c0_46] : memref<32x32xf32, #tpu.memory_space<vmem>>, vector<32x32xf32>
      %cst_47 = arith.constant dense<0.000000e+00> : vector<8x32xf32>
      %84 = tpu.matmul %82, %83, %cst_47 {dimension_numbers = #tpu.dot_dimension_numbers<[1], [0], [0], [1], [0, 0, 1, 1], [], []>} : vector<8x32xf32>, vector<32x32xf32>, vector<8x32xf32> -> vector<8x32xf32>
      %c0_48 = arith.constant 0 : index
      %c0_49 = arith.constant 0 : index
      %85 = vector.load %arg6[%c0_48, %c0_49] : memref<1x32xf32, #tpu.memory_space<vmem>>, vector<1x32xf32>
      %86 = vector.broadcast %85 : vector<1x32xf32> to vector<8x32xf32>
      %87 = arith.addf %84, %86 : vector<8x32xf32>
      %c0_50 = arith.constant 0 : index
      %c0_51 = arith.constant 0 : index
      %88 = vector.load %arg14[%c0_50, %c0_51] : memref<8x32xf32, #tpu.memory_space<vmem>>, vector<8x32xf32>
      tpu.vector_store %arg14[%c0_50, %c0_51], %87 {strides = array<i32>} : memref<8x32xf32, #tpu.memory_space<vmem>>, vector<8x32xf32>,
      %c0_52 = arith.constant 0 : index
      %c0_53 = arith.constant 0 : index
      %89 = vector.load %arg7[%c0_52, %c0_53] : memref<32x32xf32, #tpu.memory_space<vmem>>, vector<32x32xf32>
      %cst_54 = arith.constant dense<0.000000e+00> : vector<8x32xf32>
      %90 = tpu.matmul %82, %89, %cst_54 {dimension_numbers = #tpu.dot_dimension_numbers<[1], [0], [0], [1], [0, 0, 1, 1], [], []>} : vector<8x32xf32>, vector<32x32xf32>, vector<8x32xf32> -> vector<8x32xf32>
      %c0_55 = arith.constant 0 : index
      %c0_56 = arith.constant 0 : index
      %91 = vector.load %arg8[%c0_55, %c0_56] : memref<1x32xf32, #tpu.memory_space<vmem>>, vector<1x32xf32>
      %92 = vector.broadcast %91 : vector<1x32xf32> to vector<8x32xf32>
      %93 = arith.addf %90, %92 : vector<8x32xf32>
      %c0_57 = arith.constant 0 : index
      %c0_58 = arith.constant 0 : index
      %94 = vector.load %arg15[%c0_57, %c0_58] : memref<8x32xf32, #tpu.memory_space<vmem>>, vector<8x32xf32>
      tpu.vector_store %arg15[%c0_57, %c0_58], %93 {strides = array<i32>} : memref<8x32xf32, #tpu.memory_space<vmem>>, vector<8x32xf32>,
    } else {
    }
    %c8_i32 = arith.constant 8 : i32
    %3 = arith.muli %arg1, %c8_i32 : i32
    %4 = tpu.assume_multiple %3, 8 : i32
    %c0 = arith.constant 0 : index
    %5 = arith.index_cast %4 : i32 to index
    %c0_1 = arith.constant 0 : index
    %6 = vector.load %arg2[%c0, %5, %c0_1] : memref<1x8x32xf32, #tpu.memory_space<vmem>>, vector<1x8x32xf32>
    %7 = vector.shape_cast %6 : vector<1x8x32xf32> to vector<8x32xf32>
    %c0_2 = arith.constant 0 : index
    %c0_3 = arith.constant 0 : index
    %8 = vector.load %arg3[%c0_2, %c0_3] : memref<32x32xf32, #tpu.memory_space<vmem>>, vector<32x32xf32>
    %cst = arith.constant dense<0.000000e+00> : vector<8x32xf32>
    %9 = tpu.matmul %7, %8, %cst {dimension_numbers = #tpu.dot_dimension_numbers<[1], [0], [0], [1], [0, 0, 1, 1], [], []>} : vector<8x32xf32>, vector<32x32xf32>, vector<8x32xf32> -> vector<8x32xf32>
    %c0_4 = arith.constant 0 : index
    %c0_5 = arith.constant 0 : index
    %10 = vector.load %arg4[%c0_4, %c0_5] : memref<1x32xf32, #tpu.memory_space<vmem>>, vector<1x32xf32>
    %11 = vector.broadcast %10 : vector<1x32xf32> to vector<8x32xf32>
    %12 = arith.addf %9, %11 : vector<8x32xf32>
    %cst_6 = arith.constant 2.500000e-01 : f32
    %13 = vector.broadcast %cst_6 : f32 to vector<8x32xf32>
    %14 = arith.mulf %12, %13 : vector<8x32xf32>
    %15 = vector.extract_strided_slice %14 {offsets = [0, 0], sizes = [8, 16], strides = [1, 1]} : vector<8x32xf32> to vector<8x16xf32>
    %c0_7 = arith.constant 0 : index
    %c0_8 = arith.constant 0 : index
    %16 = vector.load %arg14[%c0_7, %c0_8] : memref<8x32xf32, #tpu.memory_space<vmem>>, vector<8x16xf32>
    %c0_9 = arith.constant 0 : index
    %c0_10 = arith.constant 0 : index
    %17 = vector.load %arg15[%c0_9, %c0_10] : memref<8x32xf32, #tpu.memory_space<vmem>>, vector<8x16xf32>
    %cst_11 = arith.constant dense<0.000000e+00> : vector<8x8xf32>
    %18 = tpu.matmul %15, %16, %cst_11 {dimension_numbers = #tpu.dot_dimension_numbers<[1], [1], [0], [0], [0, 0, 1, 0], [], []>} : vector<8x16xf32>, vector<8x16xf32>, vector<8x8xf32> -> vector<8x8xf32>
    %cst_12 = arith.constant dense<0xFF800000> : vector<8xf32>
    %19 = vector.multi_reduction <maximumf>, %18, %cst_12 [1] : vector<8x8xf32> to vector<8xf32>
    %20 = vector.shape_cast %19 : vector<8xf32> to vector<8x1xf32>
    %21 = vector.broadcast %20 : vector<8x1xf32> to vector<8x8xf32>
    %22 = arith.subf %18, %21 : vector<8x8xf32>
    %23 = math.exp %22 : vector<8x8xf32>
    %cst_13 = arith.constant dense<0.000000e+00> : vector<8xf32>
    %24 = vector.multi_reduction <add>, %23, %cst_13 [1] : vector<8x8xf32> to vector<8xf32>
    %25 = vector.shape_cast %24 : vector<8xf32> to vector<8x1xf32>
    %cst_14 = arith.constant dense<0.000000e+00> : vector<8x16xf32>
    %26 = tpu.matmul %23, %17, %cst_14 {dimension_numbers = #tpu.dot_dimension_numbers<[1], [0], [0], [1], [0, 0, 1, 1], [], []>} : vector<8x8xf32>, vector<8x16xf32>, vector<8x16xf32> -> vector<8x16xf32>
    %27 = tpu.reciprocal %25 : vector<8x1xf32> -> vector<8x1xf32>
    %28 = vector.broadcast %27 : vector<8x1xf32> to vector<8x16xf32>
    %29 = arith.mulf %26, %28 : vector<8x16xf32>
    %c0_15 = arith.constant 0 : index
    %c0_16 = arith.constant 0 : index
    %30 = vector.load %arg9[%c0_15, %c0_16] : memref<32x32xf32, #tpu.memory_space<vmem>>, vector<16x32xf32>
    %cst_17 = arith.constant dense<0.000000e+00> : vector<8x32xf32>
    %31 = tpu.matmul %29, %30, %cst_17 {dimension_numbers = #tpu.dot_dimension_numbers<[1], [0], [0], [1], [0, 0, 1, 1], [], []>} : vector<8x16xf32>, vector<16x32xf32>, vector<8x32xf32> -> vector<8x32xf32>
    %32 = vector.extract_strided_slice %14 {offsets = [0, 16], sizes = [8, 16], strides = [1, 1]} : vector<8x32xf32> to vector<8x16xf32>
    %c0_18 = arith.constant 0 : index
    %c16 = arith.constant 16 : index
    %33 = vector.load %arg14[%c0_18, %c16] : memref<8x32xf32, #tpu.memory_space<vmem>>, vector<8x16xf32>
    %c0_19 = arith.constant 0 : index
    %c16_20 = arith.constant 16 : index
    %34 = vector.load %arg15[%c0_19, %c16_20] : memref<8x32xf32, #tpu.memory_space<vmem>>, vector<8x16xf32>
    %cst_21 = arith.constant dense<0.000000e+00> : vector<8x8xf32>
    %35 = tpu.matmul %32, %33, %cst_21 {dimension_numbers = #tpu.dot_dimension_numbers<[1], [1], [0], [0], [0, 0, 1, 0], [], []>} : vector<8x16xf32>, vector<8x16xf32>, vector<8x8xf32> -> vector<8x8xf32>
    %cst_22 = arith.constant dense<0xFF800000> : vector<8xf32>
    %36 = vector.multi_reduction <maximumf>, %35, %cst_22 [1] : vector<8x8xf32> to vector<8xf32>
    %37 = vector.shape_cast %36 : vector<8xf32> to vector<8x1xf32>
    %38 = vector.broadcast %37 : vector<8x1xf32> to vector<8x8xf32>
    %39 = arith.subf %35, %38 : vector<8x8xf32>
    %40 = math.exp %39 : vector<8x8xf32>
    %cst_23 = arith.constant dense<0.000000e+00> : vector<8xf32>
    %41 = vector.multi_reduction <add>, %40, %cst_23 [1] : vector<8x8xf32> to vector<8xf32>
    %42 = vector.shape_cast %41 : vector<8xf32> to vector<8x1xf32>
    %cst_24 = arith.constant dense<0.000000e+00> : vector<8x16xf32>
    %43 = tpu.matmul %40, %34, %cst_24 {dimension_numbers = #tpu.dot_dimension_numbers<[1], [0], [0], [1], [0, 0, 1, 1], [], []>} : vector<8x8xf32>, vector<8x16xf32>, vector<8x16xf32> -> vector<8x16xf32>
    %44 = tpu.reciprocal %42 : vector<8x1xf32> -> vector<8x1xf32>
    %45 = vector.broadcast %44 : vector<8x1xf32> to vector<8x16xf32>
    %46 = arith.mulf %43, %45 : vector<8x16xf32>
    %c16_25 = arith.constant 16 : index
    %c0_26 = arith.constant 0 : index
    %47 = vector.load %arg9[%c16_25, %c0_26] : memref<32x32xf32, #tpu.memory_space<vmem>>, vector<16x32xf32>
    %cst_27 = arith.constant dense<0.000000e+00> : vector<8x32xf32>
    %48 = tpu.matmul %46, %47, %cst_27 {dimension_numbers = #tpu.dot_dimension_numbers<[1], [0], [0], [1], [0, 0, 1, 1], [], []>} : vector<8x16xf32>, vector<16x32xf32>, vector<8x32xf32> -> vector<8x32xf32>
    %49 = arith.addf %31, %48 : vector<8x32xf32>
    %c0_28 = arith.constant 0 : index
    %c0_29 = arith.constant 0 : index
    %50 = vector.load %arg10[%c0_28, %c0_29] : memref<1x32xf32, #tpu.memory_space<vmem>>, vector<1x32xf32>
    %51 = vector.broadcast %50 : vector<1x32xf32> to vector<8x32xf32>
    %52 = arith.addf %49, %51 : vector<8x32xf32>
    %53 = arith.addf %52, %7 : vector<8x32xf32>
    %cst_30 = arith.constant dense<0.000000e+00> : vector<8xf32>
    %54 = vector.multi_reduction <add>, %53, %cst_30 [1] : vector<8x32xf32> to vector<8xf32>
    %55 = vector.shape_cast %54 : vector<8xf32> to vector<8x1xf32>
    %cst_31 = arith.constant 3.200000e+01 : f32
    %56 = vector.broadcast %cst_31 : f32 to vector<8x1xf32>
    %57 = arith.divf %55, %56 : vector<8x1xf32>
    %58 = vector.broadcast %57 : vector<8x1xf32> to vector<8x32xf32>
    %59 = arith.subf %53, %58 : vector<8x32xf32>
    %60 = arith.mulf %59, %59 : vector<8x32xf32>
    %cst_32 = arith.constant dense<0.000000e+00> : vector<8xf32>
    %61 = vector.multi_reduction <add>, %60, %cst_32 [1] : vector<8x32xf32> to vector<8xf32>
    %62 = vector.shape_cast %61 : vector<8xf32> to vector<8x1xf32>
    %cst_33 = arith.constant 3.200000e+01 : f32
    %63 = vector.broadcast %cst_33 : f32 to vector<8x1xf32>
    %64 = arith.divf %62, %63 : vector<8x1xf32>
    %65 = vector.broadcast %57 : vector<8x1xf32> to vector<8x32xf32>
    %66 = arith.subf %53, %65 : vector<8x32xf32>
    %cst_34 = arith.constant 9.99999996E-13 : f32
    %67 = vector.broadcast %cst_34 : f32 to vector<8x1xf32>
    %68 = arith.addf %64, %67 : vector<8x1xf32>
    %69 = math.rsqrt %68 : vector<8x1xf32>
    %70 = vector.broadcast %69 : vector<8x1xf32> to vector<8x32xf32>
    %71 = arith.mulf %66, %70 : vector<8x32xf32>
    %c0_35 = arith.constant 0 : index
    %c0_36 = arith.constant 0 : index
    %72 = vector.load %arg11[%c0_35, %c0_36] : memref<1x32xf32, #tpu.memory_space<vmem>>, vector<1x32xf32>
    %73 = vector.broadcast %72 : vector<1x32xf32> to vector<8x32xf32>
    %74 = arith.mulf %71, %73 : vector<8x32xf32>
    %c0_37 = arith.constant 0 : index
    %c0_38 = arith.constant 0 : index
    %75 = vector.load %arg12[%c0_37, %c0_38] : memref<1x32xf32, #tpu.memory_space<vmem>>, vector<1x32xf32>
    %76 = vector.broadcast %75 : vector<1x32xf32> to vector<8x32xf32>
    %77 = arith.addf %74, %76 : vector<8x32xf32>
    %c0_39 = arith.constant 0 : index
    %c0_40 = arith.constant 0 : index
    %c0_41 = arith.constant 0 : index
    %78 = vector.load %arg13[%c0_39, %c0_40, %c0_41] : memref<1x8x32xf32, #tpu.memory_space<vmem>>, vector<1x8x32xf32>
    %79 = vector.shape_cast %78 : vector<1x8x32xf32> to vector<8x32xf32>
    %80 = vector.shape_cast %77 : vector<8x32xf32> to vector<1x8x32xf32>
    tpu.vector_store %arg13[%c0_39, %c0_40, %c0_41], %80 {strides = array<i32>} : memref<1x8x32xf32, #tpu.memory_space<vmem>>, vector<1x8x32xf32>,
    return
  }
  func.func @transform_0(%arg0: i32, %arg1: i32) -> (i32, i32, i32) {
    %c0_i32 = arith.constant 0 : i32
    %c0_i32_0 = arith.constant 0 : i32
    %c0_i32_1 = arith.constant 0 : i32
    return %arg0, %c0_i32, %c0_i32_0 : i32, i32, i32
  }
  func.func @transform_1(%arg0: i32, %arg1: i32) -> (i32, i32) {
    %c0_i32 = arith.constant 0 : i32
    %c0_i32_0 = arith.constant 0 : i32
    %c0_i32_1 = arith.constant 0 : i32
    return %c0_i32, %c0_i32_0 : i32, i32
  }
  func.func @transform_2(%arg0: i32, %arg1: i32) -> (i32, i32) {
    %c0_i32 = arith.constant 0 : i32
    %c0_i32_0 = arith.constant 0 : i32
    %c0_i32_1 = arith.constant 0 : i32
    return %c0_i32, %c0_i32_0 : i32, i32
  }
  func.func @transform_3(%arg0: i32, %arg1: i32) -> (i32, i32) {
    %c0_i32 = arith.constant 0 : i32
    %c0_i32_0 = arith.constant 0 : i32
    %c0_i32_1 = arith.constant 0 : i32
    return %c0_i32, %c0_i32_0 : i32, i32
  }
  func.func @transform_4(%arg0: i32, %arg1: i32) -> (i32, i32) {
    %c0_i32 = arith.constant 0 : i32
    %c0_i32_0 = arith.constant 0 : i32
    %c0_i32_1 = arith.constant 0 : i32
    return %c0_i32, %c0_i32_0 : i32, i32
  }
  func.func @transform_5(%arg0: i32, %arg1: i32) -> (i32, i32) {
    %c0_i32 = arith.constant 0 : i32
    %c0_i32_0 = arith.constant 0 : i32
    %c0_i32_1 = arith.constant 0 : i32
    return %c0_i32, %c0_i32_0 : i32, i32
  }
  func.func @transform_6(%arg0: i32, %arg1: i32) -> (i32, i32) {
    %c0_i32 = arith.constant 0 : i32
    %c0_i32_0 = arith.constant 0 : i32
    %c0_i32_1 = arith.constant 0 : i32
    return %c0_i32, %c0_i32_0 : i32, i32
  }
  func.func @transform_7(%arg0: i32, %arg1: i32) -> (i32, i32) {
    %c0_i32 = arith.constant 0 : i32
    %c0_i32_0 = arith.constant 0 : i32
    %c0_i32_1 = arith.constant 0 : i32
    return %c0_i32, %c0_i32_0 : i32, i32
  }
  func.func @transform_8(%arg0: i32, %arg1: i32) -> (i32, i32) {
    %c0_i32 = arith.constant 0 : i32
    %c0_i32_0 = arith.constant 0 : i32
    %c0_i32_1 = arith.constant 0 : i32
    return %c0_i32, %c0_i32_0 : i32, i32
  }
  func.func @transform_9(%arg0: i32, %arg1: i32) -> (i32, i32) {
    %c0_i32 = arith.constant 0 : i32
    %c0_i32_0 = arith.constant 0 : i32
    %c0_i32_1 = arith.constant 0 : i32
    return %c0_i32, %c0_i32_0 : i32, i32
  }
  func.func @transform_10(%arg0: i32, %arg1: i32) -> (i32, i32) {
    %c0_i32 = arith.constant 0 : i32
    %c0_i32_0 = arith.constant 0 : i32
    %c0_i32_1 = arith.constant 0 : i32
    return %c0_i32, %c0_i32_0 : i32, i32
  }
  func.func @transform_11(%arg0: i32, %arg1: i32) -> (i32, i32, i32) {
    %c0_i32 = arith.constant 0 : i32
    %c0_i32_0 = arith.constant 0 : i32
    return %arg0, %arg1, %c0_i32 : i32, i32, i32
  }
}

</mosaic_0001>

<bundles_post_ra>
// kernel: tpu_custom_call.1
= control target key start
LH: loop header
LB: loop body
LE: loop exit
PB: predicated region body
PF: predicated region fallthrough
CT: control target
= control target key end

     0   :  { %s1656_s0 = inlined_call_operand.hbm [shape: f32[2,8,32], index: 0, kind: input, shape index: {}]   ;;  %s1657_s1 = inlined_call_operand.hbm [shape: f32[32,32], index: 1, kind: input, shape index: {}]   ;;  %s1658_s2 = inlined_call_operand.vmem [shape: f32[1,32], index: 2, kind: input, shape index: {}]   ;;  %s1659_s3 = inlined_call_operand.hbm [shape: f32[32,32], index: 3, kind: input, shape index: {}]   ;;  %s1660_s4 = inlined_call_operand.vmem [shape: f32[1,32], index: 4, kind: input, shape index: {}]   ;;  %s1661_s5 = inlined_call_operand.hbm [shape: f32[32,32], index: 5, kind: input, shape index: {}]   ;;  %s1662_s6 = inlined_call_operand.vmem [shape: f32[1,32], index: 6, kind: input, shape index: {}]   ;;  %s1663_s7 = inlined_call_operand.hbm [shape: f32[32,32], index: 7, kind: input, shape index: {}]   ;;  %s1664_s8 = inlined_call_operand.vmem [shape: f32[1,32], index: 8, kind: input, shape index: {}]   ;;  %s1665_s9 = inlined_call_operand.vmem [shape: f32[1,32], index: 9, kind: input, shape index: {}]   ;;  %s1666_s10 = inlined_call_operand.vmem [shape: f32[1,32], index: 10, kind: input, shape index: {}]   ;;  %s1667_s11 = inlined_call_operand.hbm [shape: f32[2,8,32], index: 11, kind: output, shape index: {}]  }
   0x1   :  { %1669 = sst [smem:[#allocation18_spill]] %s1657_s1 }
   0x2   :  { %1670 = sst [smem:[#allocation19_spill]] %s1659_s3 }
   0x3   :  { %1671 = sst [smem:[#allocation20_spill]] %s1661_s5 }
   0x4   :  { %1672 = sst [smem:[#allocation21_spill]] %s1663_s7 }
   0x5   :  { %1673 = sst [smem:[#allocation22_spill]] %s1666_s10 }
   0x6   :  { %16 = vsyncpa [#allocation5], 0 }
   0x7   :  { %18 = vsyncpa [#allocation5 + $0x1], 0 }
   0x8   :  { %19 = vsyncpa [#allocation8], 0 }
   0x9   :  { %20 = vsyncpa [#allocation11], 0 }
   0xa   :  { %21 = vsyncpa [#allocation6], 0 }
   0xb   :  { %23 = vsyncpa [#allocation6 + $0x1], 0  ;;  %s1442_s17 = smov 0   ;;  %s1444_s18 = smov 0  }
   0xc   :  { %s1446_s19 = smov 0   ;;  %s1448_s20 = smov 0  }
   0xd   :  { %s1450_s21 = smov 0   ;;  %s1452_s22 = smov 0  }
   0xe LB: > { %s1668_s23 = sadd.s32 4294967295, %s1372_s22   ;;  %p977_p0 = scmp.ge.s32.totalorder %s1372_s22, 1  ;;  %s1372_s22 = sphi %s1452_s22, %s29_s22   ;;  %s1368_s21 = sphi %s1450_s21, %s1690_s21   ;;  %s1364_s20 = sphi %s1448_s20, %s1689_s20   ;;  %s1360_s19 = sphi %s1446_s19, %s1688_s19   ;;  %s1356_s18 = sphi %s1444_s18, %s1687_s18   ;;  %s1352_s17 = sphi %s1442_s17, %s1686_s17  }
   0xf   : > { %p1476_p1 = scmp.eq.s32.totalorder %s1668_s23, 0  ;;  %p310_p2 = scmp.lt.s32.totalorder %s1372_s22, 3 }
  0x10   : > { %s1675_s1 = sld [smem:[#allocation18_spill]]  ;;  %s1374_s29 = smov [#allocation7]  }
  0x11   : > { %p1484_p3 = pnand %p977_p0, %p310_p2  ;;  %s323_s30 = sshll.u32 %s1374_s29, 4  ;;  %s324_s30 = int_to_ptr.vmem [resolvable:$true] %s323_s30 }
  0x12   : > { %p982_p6 = scmp.ge.s32.totalorder %s1372_s22, 2  ;;  %s1678_s5 = sld [smem:[#allocation20_spill]] }
  0x13   : > { %p1027_p4 = pneg %p1484_p3  ;;  %s1375_s16 = smov 128  }
  0x14   : > { %s1376_s25 = smov 8   ;;  %s1377_s26 = smov [#allocation10]  }
  0x15   : > { %p1492_p5 = pnand %p1027_p4, %p1476_p1  ;;  %s357_s29 = sshll.u32 %s1377_s26, 4  ;;  %s358_s29 = int_to_ptr.vmem [resolvable:$true] %s357_s29 }
  0x16   : > { %s321_s27 = sshll.u32 %s1675_s1, 4  ;;  %s1679_s3 = sld [smem:[#allocation19_spill]]  ;;  %s322_s27 = int_to_ptr.hbm [resolvable:$true] %s321_s27 }
  0x17   : > { %1030 = dma.hbm_to_vmem [thread:$0]  (!%p1492_p5), %s322_s27, 512, %s324_s30, [#allocation8], %s1375_s16, %s1375_s16, %s1376_s25  }
  0x18   : > { %s355_s15 = sshll.u32 %s1678_s5, 4  ;;  %s1680_s7 = sld [smem:[#allocation21_spill]]  ;;  %s356_s15 = int_to_ptr.hbm [resolvable:$true] %s355_s15 }
  0x19   : > { %1036 = dma.hbm_to_vmem [thread:$0]  (!%p1492_p5), %s356_s15, 512, %s358_s29, [#allocation11], %s1375_s16, %s1375_s16, %s1376_s25  }
  0x1a   : > { %s1378_s30 = smov [#allocation9]   ;;  %s1379_s1 = smov [#allocation12]  }
  0x1b   : > { %s340_s26 = sshll.u32 %s1378_s30, 4  ;;  %s374_s23 = sshll.u32 %s1379_s1, 4  ;;  %s341_s26 = int_to_ptr.vmem [resolvable:$true] %s340_s26  ;;  %s375_s23 = int_to_ptr.vmem [resolvable:$true] %s374_s23 }
  0x1c   : > { %s338_s10 = sshll.u32 %s1679_s3, 4  ;;  %s41_s15 = sadd.s32 1, %s1368_s21  ;;  %s339_s10 = int_to_ptr.hbm [resolvable:$true] %s338_s10 }
  0x1d   : > { %1033 = dma.hbm_to_vmem [thread:$0]  (!%p1492_p5), %s339_s10, 512, %s341_s26, [#allocation8], %s1375_s16, %s1375_s16, %s1376_s25  }
  0x1e   : > { %s372_s27 = sshll.u32 %s1680_s7, 4  ;;  %s976_s29 = sadd.s32 4294967294, %s1372_s22   ;;  %s373_s27 = int_to_ptr.hbm [resolvable:$true] %s372_s27 }
  0x1f   : > { %1039 = dma.hbm_to_vmem [thread:$0]  (!%p1492_p5), %s373_s27, 512, %s375_s23, [#allocation11], %s1375_s16, %s1375_s16, %s1376_s25  }
  0x20   : > { %p43_p7 = scmp.ge.s32.totalorder %s41_s15, 2  ;;  %s48_s13 = sadd.s32 1, %s1360_s19 }
  0x21   : > { %p55_p8 = scmp.ne.s32.totalorder %s1360_s19, %s1356_s18  ;;  %p56_p9 = scmp.eq.s32.totalorder %s1372_s22, 0 }
  0x22   : > { %s1692_s15 = smov (%p43_p7, %s41_s15), 0  ;;  %p61_p10 = scmp.ne.s32.totalorder %s1356_s18, %s1352_s17 }
  0x23   : > { %s45_s10 = ssub.s32 %s1368_s21, %s1692_s15  ;;  %s1681_s14 = sadd.s32 4294967295, %s1372_s22  }
  0x24   : > { %p297_p11 = scmp.eq.s32.totalorder %s1681_s14, 1  ;;  %p46_p12 = scmp.eq.s32.totalorder %s45_s10, 0 }
  0x25   : > { %p1530_p13 = por %p1476_p1, %p61_p10  ;;  %p303_p2 = scmp.eq.s32.totalorder %s976_s29, 1 }
  0x26   : > { %p1534_p0 = por %p297_p11, %p55_p8  ;;  %p57_p4 = por %p56_p9, %p55_p8 }
  0x27   : > { %s1539_s25 = scalar_select %p46_p12, %s1360_s19, %s48_s13  }
  0x28   : > { %p1541_p5 = por %p303_p2, %p61_p10  ;;  %s397_s30 = sand.u32 1, %s1360_s19  }
  0x29   : > { %s984_s26 = sshll.u32 %s1368_s21, 3  ;;  %p1052_p7 = scmp.lt.s32.totalorder %s1372_s22, 2 }
  0x2a   : > { %s983_s1 = sshll.u32 %s397_s30, 3  ;;  %s405_s14 = scalar_lea.hbm %s1656_s0, %s984_s26 }
  0x2b   : > { %s407_s3 = sshll.u32 %s405_s14, 4  ;;  %s401_s5 = scalar_lea.vmem [#allocation4], %s983_s1  ;;  %s408_s3 = int_to_ptr.hbm [resolvable:$true] %s407_s3 }
  0x2c   : > { %s409_s7 = sshll.u32 %s401_s5, 4  ;;  %p1041_p11 = pnand %p1052_p7, %p57_p4  ;;  %s410_s7 = int_to_ptr.vmem [resolvable:$true] %s409_s7 }
  0x2d   : > { %s398_s29 = scalar_lea.sflag [#allocation5], %s397_s30  ;;  %418 = sbr.rel (%p1484_p3) target bundleno = 1121 (0x461), region = 64 }
  0x2e   : > { %1043 = dma.hbm_to_vmem [thread:$0]  (!%p1041_p11), %s408_s3, 128, %s410_s7, %s398_s29  }
  0x2f   : > { %s1554_s13 = sand.u32 (!%p1484_p3), 1, %s1356_s18  }
  0x30   : > { %s986_s23 = sshll.u32 (!%p1484_p3), %s1554_s13, 3  ;;  %s421_s26 = scalar_lea.sflag (!%p1484_p3), [#allocation5], %s1554_s13 }
  0x31   : > { %s424_s1 = scalar_lea.vmem (!%p1484_p3), [#allocation4], %s986_s23 }
  0x32   : > { %1335 = dma.done.wait (%p1530_p13), %s421_s26, 128  }
  0x33   : > { %1337 = vsyncadd (%p1530_p13), %s421_s26, 4294967168 }
  0x34   : > { %1339 = dma.done.wait (%p1476_p1), [#allocation8], 1024  }
  0x35   : > { %1341 = vsyncadd (%p1476_p1), [#allocation8], 4294966272 }
  0x36   : > { %1343 = dma.done.wait (%p1476_p1), [#allocation11], 1024  }
  0x37   : > { %1345 = vsyncadd (%p1476_p1), [#allocation11], 4294966272  ;;  %v492_v0 = vld [vmem:[#allocation9 + $0x18] sm:$0xff]  ;;  %v491_v1 = vld [vmem:[#allocation9 + $0x10] sm:$0xff]  ;;  %vm497_vm0 = vcmask 261120   ;;  %vm589_vm1 = vcmask 130048  }
  0x38   : > { %v557_v2 = vld [vmem:[#allocation7 + $0x18] sm:$0xff]  ;;  %513 = vmatpush.msra.mxu0 %v492_v0  ;;  %v556_v3 = vld [vmem:[#allocation7 + $0x10] sm:$0xff]  ;;  %v490_v4 = vld [vmem:[#allocation9 + $0x8] sm:$0xff]  ;;  %s1380_s28 = smov 112   ;;  %vm616_vm2 = vcmask 64512   ;;  %s1004_s29 = sshll.u32 %s1364_s20, 3 }
  0x39   : > { %578 = vmatpush.msra.mxu2 %v557_v2  ;;  %v489_v5 = vld [vmem:[#allocation9] sm:$0xff]  ;;  %v555_v6 = vld [vmem:[#allocation7 + $0x8] sm:$0xff]  ;;  %v1572_v8 = vld [vmem:[%s424_s1] sm:$0xff]  ;;  %s851_s7 = scalar_lea.hbm %s1667_s11, %s1004_s29  ;;  %s1685_s12 = sld [smem:[#allocation22_spill]] }
  0x3a   : > { %514 = vmatpush.msra.mxu0 %v491_v1  ;;  %v554_v7 = vld [vmem:[#allocation7] sm:$0xff]  ;;  %v525_v9 = vld [vmem:[#allocation10 + $0x18] sm:$0xff]  ;;  %v524_v10 = vld [vmem:[#allocation10 + $0x10] sm:$0xff]  ;;  %s483_s20 = scalar_lea.vmem [#allocation13], %s986_s23  ;;  %s855_s10 = sshll.u32 %s851_s7, 4  ;;  %s856_s10 = int_to_ptr.hbm [resolvable:$true] %s855_s10 }
  0x3b   : > { %579 = vmatpush.msra.mxu2 %v556_v3  ;;  %542 = vmatpush.msra.mxu1 %v525_v9  ;;  %v523_v11 = vld [vmem:[#allocation10 + $0x8] sm:$0xff]  ;;  %v522_v12 = vld [vmem:[#allocation10] sm:$0xff]  ;;  %v746_v57 = vld [vmem:[#allocation12 + $0x18] sm:$0xff]  ;;  %s853_s30 = sshll.u32 %s483_s20, 4  ;;  %s840_s14 = scalar_lea.sflag [#allocation6], %s1554_s13  ;;  %s854_s30 = int_to_ptr.vmem [resolvable:$true] %s853_s30 }
  0x3c   : > { %515 = vmatpush.msra.mxu0 %v490_v4  ;;  %v1114_v13 = vld [vmem:[%s1660_s4] ss:$0 sm:$0xff]  ;;  %v665_v37 = vld [vmem:[#allocation12 + $0x8] sm:$0xff]  ;;  %v745_v58 = vld [vmem:[#allocation12 + $0x10] sm:$0xff]  ;;  %s1296_s26 = sshra.s32 %s856_s10, 4  ;;  %s1302_s23 = scalar_lea.hbm %s1667_s11, 16  ;;  %s1297_s26 = int_to_ptr.hbm [resolvable:$true] %s1296_s26 }
  0x3d   : > { %580 = vmatpush.msra.mxu2 %v555_v6  ;;  %543 = vmatpush.msra.mxu1 %v524_v10  ;;  %v1115_v16 = vld [vmem:[%s1658_s2] ss:$0 sm:$0xff]  ;;  %s1298_s29 = scalar_lea.hbm %s1297_s26, 8  ;;  %p1303_p9 = scmp.lt.s32.totalorder %s1297_s26, %s1667_s11 }
  0x3e   : > { %516 = vmatpush.msra.mxu0 %v489_v5  ;;  %v1116_v21 = vld [vmem:[%s1662_s6] ss:$0 sm:$0xff]  ;;  %p1299_p1 = scmp.ne.s32.totalorder %s1297_s26, %s1298_s29  ;;  %p1304_p10 = scmp.lt.s32.totalorder %s1302_s23, %s1298_s29 }
  0x3f   : > { %581 = vmatpush.msra.mxu2 %v554_v7  ;;  %992 = vmatmul.msk.f32.vlgmr.msra.gmra.mxu0 %vm497_vm0, %v1572_v8  ;;  %v664_v39 = vld [vmem:[#allocation12] sm:$0xff] }
  0x40   : > { %994 = vmatmul.msk.f32.vlgmr.msra.gmra.mxu2 %vm497_vm0, %v1572_v8  ;;  %544 = vmatpush.msra.mxu1 %v523_v11  ;;  %v1117_v9 = vld [vmem:[%s1664_s8] ss:$0 sm:$0xff]  ;;  %p1300_p3 = pnand %p1299_p1, %p1534_p0  ;;  %p1305_p12 = por %p1304_p10, %p1303_p9 }
  0x41   : > { %764 = vmatpush.msrb.mxu2 %v746_v57 }
  0x42   : > { %545 = vmatpush.msra.mxu1 %v522_v12  ;;  %p1301_p8 = pneg %p1300_p3 }
  0x43   : > { %993 = vmatmul.msk.f32.vlgmr.msra.gmra.mxu1 %vm497_vm0, %v1572_v8  ;;  %765 = vmatpush.msrb.mxu2 %v745_v58 }
  0x44   : > { %p1306_p13 = pnand %p1305_p12, %p1301_p8 }
  0xbc   : > { %v518_v14 = vpop.f32.mrf.mxu0 }
  0xbd   : > { %v519_v15 = vadd.f32 %v1114_v13, %v518_v14 }
  0xbf   : > { %521 = vst.msk [vmem:[#allocation2] sm:$0xff] %vm497_vm0, %v519_v15 }
  0xc0   : > { %v547_v22 = vpop.f32.mrf.mxu1 }
  0xc1   : > { %v548_v23 = vadd.f32 %v1116_v21, %v547_v22 }
  0xc3   : > { %v583_v17 = vpop.f32.mrf.mxu2  ;;  %550 = vst.msk [vmem:[#allocation3] sm:$0xff] %vm497_vm0, %v548_v23 }
  0xc4   : > { %v584_v18 = vadd.f32 %v1115_v16, %v583_v17  ;;  %v1381_v16 = vmov 32.0  }
  0xc6   : > { %v586_v19 = vmul.f32 0.25, %v584_v18  ;;  %v587_v20 = vld [vmem:[#allocation2] sm:$0xff] }
  0xc7   : > { %668 = vrot.lane.b32.xlu0 %v587_v20, %s1380_s28  ;;  %995 = vmatpush.xpose.msk.msra.mxu3 %vm589_vm1, %v587_v20 }
  0xca   : > { %996 = vmatmul.msk.f32.vlgmr.msra.gmra.mxu3 %vm589_vm1, %v586_v19  ;;  %v588_v25 = vld [vmem:[#allocation3] sm:$0xff] }
  0xcb   : > { %704 = vrot.lane.b32.xlu2 %v588_v25, %s1380_s28  ;;  %644 = vmatpush.msrb.mxu3 %v588_v25 }
  0xcd   : > { %787 = vmatpush.msra.mxu3 %v665_v37 }
  0xcf   : > { %666 = vrot.lane.b32.xlu0 %v586_v19, %s1380_s28  ;;  %788 = vmatpush.msra.mxu3 %v664_v39  ;;  %v1119_v39 = vld [vmem:[%s1685_s12] ss:$0 sm:$0xff] }
 0x125   : > { %v705_v36 = vpop.permute.xlu2 %704 }
 0x126   : > { %725 = vmatpush.msrb.mxu1 %v705_v36  ;;  %v1118_v36 = vld [vmem:[%s1665_s9] ss:$0 sm:$0xff] }
 0x139   : > { %v669_v24 = vpop.permute.xlu0 %668 }
 0x13a   : > { %998 = vmatpush.xpose.msk.msrb.mxu0 %vm589_vm1, %v669_v24 }
 0x141   : > { %v667_v26 = vpop.permute.xlu0 %666 }
 0x142   : > { %999 = vmatmul.msk.f32.vlgmr.msrb.gmra.mxu0 %vm589_vm1, %v667_v26 }
 0x14d   : > { %v613_v27 = vpop.f32.mrf.mxu3 }
 0x14e   : > { %v617_v28 = vsel %vm616_vm2, %v613_v27, -inf }
 0x14f   : > { %618 = vmax.xlane.f32.xlu1 %v617_v28 }
 0x1bf   : > { %v691_v29 = vpop.f32.mrf.mxu0 }
 0x1c0   : > { %v694_v30 = vsel %vm616_vm2, %v691_v29, -inf }
 0x1c1   : > { %695 = vmax.xlane.f32.xlu1 %v694_v30 }
 0x1c2   : > { %v619_v31 = vpop.xlane.xlu1 %618 }
 0x1c3   : > { %v620_v32 = vsub.f32 %v613_v27, %v619_v31 }
 0x1c5   : > { %v621_v33 = vmul.f32 1.442695, %v620_v32 }
 0x1c7   : > { %1120 = vpow2.f32 %v621_v33 }
 0x1cd   : > { %v1121_v34 = vpop.eup %1120 }
 0x1ce   : > { %997 = vmatmul.msk.f32.vlgmr.msrb.gmra.mxu3 %vm616_vm2, %v1121_v34  ;;  %v623_v35 = vsel %vm616_vm2, %v1121_v34, 0.0 }
 0x1cf   : > { %624 = vadd.xlane.f32.xlu2 %v623_v35 }
 0x234   : > { %v696_v38 = vpop.xlane.xlu1 %695 }
 0x235   : > { %v697_v40 = vsub.f32 %v691_v29, %v696_v38 }
 0x237   : > { %v698_v41 = vmul.f32 1.442695, %v697_v40 }
 0x239   : > { %1122 = vpow2.f32 %v698_v41 }
 0x23f   : > { %v1123_v42 = vpop.eup %1122 }
 0x240   : > { %1000 = vmatmul.msk.f32.vlgmr.msrb.gmra.mxu1 %vm616_vm2, %v1123_v42  ;;  %v700_v43 = vsel %vm616_vm2, %v1123_v42, 0.0 }
 0x241   : > { %701 = vadd.xlane.f32.xlu0 %v700_v43 }
 0x242   : > { %v625_v44 = vpop.xlane.xlu2 %624 }
 0x243   : > { %1124 = vrcp.f32 %v625_v44  ;;  %v660_v48 = vand.u32 2147483648, %v625_v44  ;;  %v658_v50 = vand.u32 2147483647, %v625_v44  ;;  %vm654_vm4 = vweird.f32 %v625_v44 }
 0x245   : > { %v661_v52 = vor.u32 1.1754944e-38, %v660_v48  ;;  %vm659_vm6 = vcmp.eq.f32.partialorder %v658_v50, 8.507059e+37 }
 0x249   : > { %v1125_v45 = vpop.eup %1124 }
 0x24a   : > { %v650_v46 = vmul.f32 %v1125_v45, %v625_v44  ;;  %vm655_vm3 = vweird.f32 %v1125_v45 }
 0x24b   : > { %vm656_vm5 = vmor %vm654_vm4, %vm655_vm3 }
 0x24c   : > { %v651_v47 = vsub.f32 1.0, %v650_v46 }
 0x24e   : > { %v652_v49 = vmul.f32 %v1125_v45, %v651_v47 }
 0x250   : > { %v653_v51 = vadd.f32 %v1125_v45, %v652_v49 }
 0x251   : > { %v646_v54 = vpop.f32.mrf.mxu3 }
 0x252   : > { %v657_v53 = vsel %vm656_vm5, %v1125_v45, %v653_v51 }
 0x253   : > { %v662_v55 = vsel %vm659_vm6, %v661_v52, %v657_v53 }
 0x254   : > { %v663_v56 = vmul.f32 %v662_v55, %v646_v54 }
 0x256   : > { %1002 = vmatmul.msk.f32.vlgmr.msra.gmra.mxu3 %vm589_vm1, %v663_v56 }
 0x2b4   : > { %v702_v59 = vpop.xlane.xlu0 %701 }
 0x2b5   : > { %1126 = vrcp.f32 %v702_v59  ;;  %v741_v63 = vand.u32 2147483648, %v702_v59  ;;  %v739_v1 = vand.u32 2147483647, %v702_v59  ;;  %vm735_vm8 = vweird.f32 %v702_v59 }
 0x2b6   : > { %1128 = vrcp.f32 %v1381_v16 }
 0x2b7   : > { %v742_v3 = vor.u32 1.1754944e-38, %v741_v63  ;;  %vm740_vm10 = vcmp.eq.f32.partialorder %v739_v1, 8.507059e+37 }
 0x2bb   : > { %v1127_v60 = vpop.eup %1126 }
 0x2bc   : > { %v731_v61 = vmul.f32 %v1127_v60, %v702_v59  ;;  %vm736_vm7 = vweird.f32 %v1127_v60  ;;  %v1129_v17 = vpop.eup %1128 }
 0x2bd   : > { %vm737_vm9 = vmor %vm735_vm8, %vm736_vm7  ;;  %v727_v5 = vpop.f32.mrf.mxu1  ;;  %v803_v18 = vmul.f32 32.0, %v1129_v17  ;;  %vm807_vm11 = vweird.f32 %v1129_v17 }
 0x2be   : > { %v732_v62 = vsub.f32 1.0, %v731_v61 }
 0x2bf   : > { %v804_v19 = vsub.f32 1.0, %v803_v18 }
 0x2c0   : > { %v733_v0 = vmul.f32 %v1127_v60, %v732_v62 }
 0x2c1   : > { %v805_v20 = vmul.f32 %v1129_v17, %v804_v19 }
 0x2c2   : > { %v734_v2 = vadd.f32 %v1127_v60, %v733_v0 }
 0x2c3   : > { %v806_v21 = vadd.f32 %v1129_v17, %v805_v20 }
 0x2c4   : > { %v738_v4 = vsel %vm737_vm9, %v1127_v60, %v734_v2 }
 0x2c5   : > { %v743_v6 = vsel %vm740_vm10, %v742_v3, %v738_v4  ;;  %v808_v22 = vsel %vm807_vm11, %v1129_v17, %v806_v21 }
 0x2c6   : > { %v744_v7 = vmul.f32 %v743_v6, %v727_v5 }
 0x2c8   : > { %1001 = vmatmul.msk.f32.vlgmr.msrb.gmra.mxu2 %vm589_vm1, %v744_v7 }
 0x2d9   : > { %v790_v10 = vpop.f32.mrf.mxu3 }
 0x34b   : > { %v767_v11 = vpop.f32.mrf.mxu2 }
 0x34c   : > { %v791_v12 = vadd.f32 %v790_v10, %v767_v11 }
 0x34e   : > { %v797_v13 = vadd.f32 %v1117_v9, %v791_v12 }
 0x350   : > { %v798_v14 = vadd.f32 %v797_v13, %v1572_v8 }
 0x352   : > { %v799_v15 = vsel %vm497_vm0, %v798_v14, 0.0 }
 0x353   : > { %800 = vadd.xlane.f32.xlu1 %v799_v15 }
 0x3c6   : > { %v801_v23 = vpop.xlane.xlu1 %800 }
 0x3c7   : > { %v809_v24 = vmul.f32 %v808_v22, %v801_v23 }
 0x3c9   : > { %v810_v25 = vsub.f32 %v798_v14, %v809_v24 }
 0x3cb   : > { %v811_v26 = vmul.f32 %v810_v25, %v810_v25 }
 0x3cd   : > { %v812_v27 = vsel %vm497_vm0, %v811_v26, 0.0 }
 0x3ce   : > { %813 = vadd.xlane.f32.xlu1 %v812_v27 }
 0x441   : > { %v814_v8 = vpop.xlane.xlu1 %813 }
 0x442   : > { %v815_v28 = vmul.f32 %v814_v8, %v808_v22 }
 0x444   : > { %v816_v29 = vadd.f32 1e-12, %v815_v28 }
 0x446   : > { %1130 = vrsqrt.f32 %v816_v29  ;;  %vm823_vm13 = vweird.f32 %v816_v29 }
 0x44c   : > { %v1131_v30 = vpop.eup %1130 }
 0x44d   : > { %v818_v31 = vmul.f32 %v1131_v30, %v816_v29  ;;  %vm824_vm12 = vweird.f32 %v1131_v30 }
 0x44e   : > { %vm825_vm14 = vmor %vm823_vm13, %vm824_vm12 }
 0x44f   : > { %v819_v32 = vmul.f32 %v1131_v30, %v818_v31 }
 0x451   : > { %v820_v33 = vmul.f32 0.5, %v819_v32 }
 0x453   : > { %v821_v34 = vsub.f32 1.5, %v820_v33 }
 0x455   : > { %v822_v35 = vmul.f32 %v1131_v30, %v821_v34 }
 0x457   : > { %v826_v37 = vsel %vm825_vm14, %v1131_v30, %v822_v35 }
 0x458   : > { %v827_v38 = vmul.f32 %v826_v37, %v810_v25 }
 0x45a   : > { %v832_v40 = vmul.f32 %v1118_v36, %v827_v38 }
 0x45c   : > { %v837_v41 = vadd.f32 %v1119_v39, %v832_v40 }
 0x45e   : > { %838 = vst.msk [vmem:[%s483_s20] sm:$0xff] %vm497_vm0, %v837_v41 }
 0x45f   : > { %1309 = shalt.err (!%p1306_p13)
}
 0x460   : > { %1025 = dma.vmem_to_hbm [thread:$0]  (%p1534_p0), %s854_s30, 128, %s856_s10, %s840_s14  }
 0x461 PF: > { %s867_s13 = sand.u32 1, %s1352_s17   ;;  %p1045_p2 = pnand %p982_p6, %p1541_p5 }
 0x462   : > { %s868_s24 = scalar_lea.sflag [#allocation6], %s867_s13 }
 0x463   : > { %p1046_p4 = pneg %p1045_p2 }
 0x465   : > { %1347 = dma.done.wait (%p1046_p4), %s868_s24, 128  }
 0x466   : > { %1349 = vsyncadd (%p1046_p4), %s868_s24, 4294967168  ;;  %s29_s22 = sadd.s32 1, %s1372_s22   ;;  %s1686_s17 = smov %s1356_s18 }
 0x467   : > { %p26_p7 = scmp.ge.s32.totalorder %s29_s22, 4   ;;  %s1687_s18 = smov %s1360_s19 }
 0x468   : > { %s1688_s19 = smov %s1539_s25  ;;  %s1689_s20 = smov %s1368_s21 }
 0x469   : > { %s1690_s21 = smov %s1692_s15  ;;  %28 = sbr.rel (!%p26_p7) target bundleno = 14 (0xe), region = 130 }
 0x46e   :  { %874 = vsyncpa [#allocation5], 1 }
 0x46f   :  { %876 = vsyncpa [#allocation5 + $0x1], 1 }
 0x470   :  { %877 = vsyncpa [#allocation8], 1 }
 0x471   :  { %878 = vsyncpa [#allocation11], 1 }
 0x472   :  { %879 = vsyncpa [#allocation6], 1 }
 0x473   :  { %881 = vsyncpa [#allocation6 + $0x1], 1 }

</bundles_post_ra>
